<compile_context>
chip_gen: v7x
topology: tpu7x:2x2x1
jax: 0.10.0
libtpu: 0.0.40
codegen_flags: <defaults>
</compile_context>

<pallas_src>
import functools

import jax
import jax.numpy as jnp
from jax import lax
from jax.experimental import pallas as pl
from jax.experimental.pallas import tpu as pltpu


# --------------------------- per-generation budgets -------------------------- #

def _tpu_vmem_capacity_bytes():
    """Best-effort VMEM capacity query; conservative (v7x per-TC) fallback."""
    try:
        info = pltpu.get_tpu_info()
        cap = getattr(info, "vmem_capacity_bytes", None)
        if cap:
            return int(cap)
    except Exception:
        pass
    return 64 * 1024 * 1024


_VMEM_CAP_BYTES = _tpu_vmem_capacity_bytes()
# Streaming budget per double-buffered operand set: generous on 128 MiB parts
# (v5e/v6e), tight on v7x's 64 MiB per TensorCore.
_TILE_BUDGET_BYTES = 12 * 1024 * 1024 if _VMEM_CAP_BYTES >= (96 << 20) else 4 * 1024 * 1024
_VMEM_LIMIT_BYTES = min(96 << 20, (_VMEM_CAP_BYTES * 3) // 4)
_MAX_TILE_LANES = 32768
_MIN_GRID_STEPS = 4          # keep both v7x TensorCores fed on the parallel grid


def _spatial_tile(s, per_col_bytes, batch=1):
    """Lane-dim (spatial) tile: a multiple of 128 sized from the VMEM budget
    (double-buffered streams), capped so the grid keeps >= _MIN_GRID_STEPS
    points when the spatial dim allows; falls back to the full dim for small s."""
    t = _TILE_BUDGET_BYTES // max(1, 2 * per_col_bytes)   # x2: double buffering
    t = max(128, min(int(t), _MAX_TILE_LANES))
    t = (t // 128) * 128
    steps = -(-_MIN_GRID_STEPS // max(1, batch))          # ceil: spatial steps wanted
    if steps > 1 and s >= steps * 128:
        per_step = -(-s // steps)                         # ceil(s / steps)
        per_step = -(-per_step // 128) * 128              # round up to 128-multiple
        t = min(t, per_step)
    return s if t >= s else t


def _compiler_params():
    return pltpu.CompilerParams(
        dimension_semantics=("parallel", "parallel"),
        vmem_limit_bytes=_VMEM_LIMIT_BYTES,
    )


# ----------------------------- Pallas kernels ------------------------------ #

def _phi_kernel(g_ref, w_ref, b_ref, out_ref):
    # phi 1x1x1 conv: (I, Cg) @ (Cg, St) + bias, channels on sublanes; bf16 out.
    phi = jnp.dot(w_ref[...], g_ref[0], preferred_element_type=jnp.float32) + b_ref[...]
    out_ref[0] = phi.astype(out_ref.dtype)


def _attention_kernel(xt_ref, phi_ref, tw_ref, psiw_ref, psib_ref, out_ref):
    # theta: strided k=stride conv as one (I, C*k^3) @ (C*k^3, St2) matmul (bf16->f32).
    theta = jnp.dot(tw_ref[...], xt_ref[0], preferred_element_type=jnp.float32)
    f = jnp.maximum(theta + phi_ref[0].astype(jnp.float32), 0.0)   # ReLU (f32)
    # psi (I -> 1): VPU multiply + sublane reduction; bias scalar from SMEM.
    logits = jnp.sum(f * psiw_ref[...], axis=0, keepdims=True) + psib_ref[0]
    out_ref[0] = jax.nn.sigmoid(logits)                            # (1, St2), lane-dense


def _attention_fused_kernel(xt_ref, g_ref, tw_ref, pw_ref, pb_ref,
                            psiw_ref, psib_ref, out_ref):
    # Identity-upsample case: phi fused in-kernel (no (B, I, S2) HBM round-trip).
    theta = jnp.dot(tw_ref[...], xt_ref[0], preferred_element_type=jnp.float32)
    phi = jnp.dot(pw_ref[...], g_ref[0], preferred_element_type=jnp.float32) + pb_ref[...]
    f = jnp.maximum(theta + phi, 0.0)                              # ReLU (f32)
    logits = jnp.sum(f * psiw_ref[...], axis=0, keepdims=True) + psib_ref[0]
    out_ref[0] = jax.nn.sigmoid(logits)


def _gate_w_kernel(x_ref, att_ref, w_ref, b_ref, out_ref):
    # y = sigm_psi_f * x (bf16 VPU), then W 1x1x1 conv with BN folded (bf16 MXU, f32 acc).
    y = x_ref[0] * att_ref[0]
    out_ref[0] = (
        jnp.dot(w_ref[...], y, preferred_element_type=jnp.float32) + b_ref[...]
    )


# --------------------------- pallas_call wrappers --------------------------- #

def phi_conv(g_cf, w, b):
    """g_cf: (B, Cg, Sg) bf16 -> phi(g): (B, I, Sg) bf16."""
    B, Cg, Sg = g_cf.shape
    I = w.shape[0]
    st = _spatial_tile(Sg, Cg * 2 + I * 2, batch=B)
    return pl.pallas_call(
        _phi_kernel,
        out_shape=jax.ShapeDtypeStruct((B, I, Sg), jnp.bfloat16),
        grid=(B, pl.cdiv(Sg, st)),
        in_specs=[
            pl.BlockSpec((1, Cg, st), lambda b, s: (b, 0, s)),
            pl.BlockSpec((I, Cg), lambda b, s: (0, 0)),
            pl.BlockSpec((I, 1), lambda b, s: (0, 0)),
        ],
        out_specs=pl.BlockSpec((1, I, st), lambda b, s: (b, 0, s)),
        compiler_params=_compiler_params(),
    )(g_cf, w, b)


def attention_map(x_taps, phi_up, theta_w, psi_w, psi_b):
    """x_taps: (B, C*K, S2) bf16, phi_up: (B, I, S2) bf16 -> sigm(psi(...)): (B, 1, S2) f32."""
    B, CK, S2 = x_taps.shape
    I = theta_w.shape[0]
    st = _spatial_tile(S2, CK * 2 + I * 2 + 4, batch=B)
    return pl.pallas_call(
        _attention_kernel,
        out_shape=jax.ShapeDtypeStruct((B, 1, S2), jnp.float32),
        grid=(B, pl.cdiv(S2, st)),
        in_specs=[
            pl.BlockSpec((1, CK, st), lambda b, s: (b, 0, s)),
            pl.BlockSpec((1, I, st), lambda b, s: (b, 0, s)),
            pl.BlockSpec((I, CK), lambda b, s: (0, 0)),
            pl.BlockSpec((I, 1), lambda b, s: (0, 0)),
            pl.BlockSpec(memory_space=pltpu.MemorySpace.SMEM),   # psi bias scalar
        ],
        out_specs=pl.BlockSpec((1, 1, st), lambda b, s: (b, 0, s)),
        compiler_params=_compiler_params(),
    )(x_taps, phi_up, theta_w, psi_w, psi_b)


def attention_map_fused(x_taps, g_cf, theta_w, phi_w, phi_b, psi_w, psi_b):
    """Fused phi path: x_taps (B,C*K,S2) bf16, g_cf (B,Cg,S2) bf16 -> (B,1,S2) f32."""
    B, CK, S2 = x_taps.shape
    Cg = g_cf.shape[1]
    I = theta_w.shape[0]
    st = _spatial_tile(S2, CK * 2 + Cg * 2 + 4, batch=B)
    return pl.pallas_call(
        _attention_fused_kernel,
        out_shape=jax.ShapeDtypeStruct((B, 1, S2), jnp.float32),
        grid=(B, pl.cdiv(S2, st)),
        in_specs=[
            pl.BlockSpec((1, CK, st), lambda b, s: (b, 0, s)),
            pl.BlockSpec((1, Cg, st), lambda b, s: (b, 0, s)),
            pl.BlockSpec((I, CK), lambda b, s: (0, 0)),
            pl.BlockSpec((I, Cg), lambda b, s: (0, 0)),
            pl.BlockSpec((I, 1), lambda b, s: (0, 0)),
            pl.BlockSpec((I, 1), lambda b, s: (0, 0)),
            pl.BlockSpec(memory_space=pltpu.MemorySpace.SMEM),   # psi bias scalar
        ],
        out_specs=pl.BlockSpec((1, 1, st), lambda b, s: (b, 0, s)),
        compiler_params=_compiler_params(),
    )(x_taps, g_cf, theta_w, phi_w, phi_b, psi_w, psi_b)


def gated_w_conv(x_cf, att_cf, w, b):
    """x_cf: (B, C, S) bf16, att_cf: (B, 1, S) bf16 -> W(att*x)+BN: (B, C, S) f32."""
    B, C, S = x_cf.shape
    st = _spatial_tile(S, C * 2 + 2 + C * 4, batch=B)
    return pl.pallas_call(
        _gate_w_kernel,
        out_shape=jax.ShapeDtypeStruct((B, C, S), jnp.float32),
        grid=(B, pl.cdiv(S, st)),
        in_specs=[
            pl.BlockSpec((1, C, st), lambda b, s: (b, 0, s)),
            pl.BlockSpec((1, 1, st), lambda b, s: (b, 0, s)),
            pl.BlockSpec((C, C), lambda b, s: (0, 0)),
            pl.BlockSpec((C, 1), lambda b, s: (0, 0)),
        ],
        out_specs=pl.BlockSpec((1, C, st), lambda b, s: (b, 0, s)),
        compiler_params=_compiler_params(),
    )(x_cf, att_cf, w, b)


# ------------------------------- module glue -------------------------------- #

def _extract_taps(x, sub):
    """x: (B,C,T,H,W) NCDHW -> (B, C*kt*kh*kw, T2*H2*W2), column order (c,kt,kh,kw)."""
    B, C, T, H, W = x.shape
    kt, kh, kw = sub
    T2, H2, W2 = (T - kt) // kt + 1, (H - kh) // kh + 1, (W - kw) // kw + 1
    xc = x[:, :, : T2 * kt, : H2 * kh, : W2 * kw]
    xr = xc.reshape(B, C, T2, kt, H2, kh, W2, kw)
    xr = jnp.transpose(xr, (0, 1, 3, 5, 7, 2, 4, 6))   # B, C, kt, kh, kw, T2, H2, W2
    return xr.reshape(B, C * kt * kh * kw, T2 * H2 * W2), (T2, H2, W2)


def init_raw_params(key, in_channels, gating_channels, inter_channels=None,
                    sub_sample_factor=(2, 2, 2)):
    if inter_channels is None:
        inter_channels = in_channels // 2
        if inter_channels == 0:
            inter_channels = 1
    C, Cg, I = in_channels, gating_channels, inter_channels
    kt, kh, kw = sub_sample_factor
    ks = jax.random.split(key, 7)
    return {
        # theta: Conv3d(C->I, kernel=sub, stride=sub, bias=False)
        "theta_w": 0.1 * jax.random.normal(ks[0], (I, C, kt, kh, kw), jnp.float32),
        # phi: Conv3d(Cg->I, 1x1x1, bias=True)
        "phi_w": 0.1 * jax.random.normal(ks[1], (I, Cg), jnp.float32),
        "phi_b": 0.1 * jax.random.normal(ks[2], (I,), jnp.float32),
        # psi: Conv3d(I->1, 1x1x1, bias=True)
        "psi_w": 0.1 * jax.random.normal(ks[3], (1, I), jnp.float32),
        "psi_b": 0.1 * jax.random.normal(ks[4], (1,), jnp.float32),
        # W: Conv3d(C->C, 1x1x1, bias=True) + BatchNorm3d(C) eval-mode stats
        "W_w": 0.1 * jax.random.normal(ks[5], (C, C), jnp.float32),
        "W_b": 0.1 * jax.random.normal(ks[6], (C,), jnp.float32),
        "bn_gamma": jnp.ones((C,), jnp.float32),
        "bn_beta": jnp.zeros((C,), jnp.float32),
        "bn_mean": jnp.zeros((C,), jnp.float32),
        "bn_var": jnp.ones((C,), jnp.float32),
    }


def prepare_kernel_params(raw, eps=1e-5):
    """Fold eval-mode BN into the W conv, pack weights for the kernels, cast to bf16."""
    I = raw["theta_w"].shape[0]
    C = raw["theta_w"].shape[1]
    inv_std = raw["bn_gamma"] / jnp.sqrt(raw["bn_var"] + eps)
    w_fold = raw["W_w"] * inv_std[:, None]
    b_fold = raw["W_b"] * inv_std + (raw["bn_beta"] - raw["bn_mean"] * inv_std)
    return {
        "theta_w": raw["theta_w"].reshape(I, -1).astype(jnp.bfloat16),  # (I, C*k^3)
        "phi_w": raw["phi_w"].astype(jnp.bfloat16),                     # (I, Cg)
        "phi_b": raw["phi_b"].reshape(I, 1),                            # (I, 1)  f32
        "psi_w": raw["psi_w"].reshape(I, 1),                            # (I, 1)  f32 (VPU path)
        "psi_b": raw["psi_b"].reshape(1),                               # (1,)    f32 (SMEM)
        "W_w": w_fold.astype(jnp.bfloat16),                             # (C, C)  BN folded
        "W_b": b_fold.reshape(C, 1),                                    # (C, 1)  f32, BN folded
    }


@functools.partial(jax.jit, static_argnames=("sub",))
def grid_attention_forward(x, g, params, sub=(2, 2, 2)):
    """x: (B,C,T,H,W), g: (B,Cg,Tg,Hg,Wg) -> (W_y NCDHW f32, sigm_psi_f NCDHW f32)."""
    B, C, T, H, W = x.shape
    Bg, Cg, Tg, Hg, Wg = g.shape
    if Bg != B:
        raise ValueError(f"batch mismatch: x has batch {B}, g has batch {Bg}")
    I = params["theta_w"].shape[0]

    # Cast x to bf16 ONCE; the tap rearrangement (theta path) and the gate
    # kernel's flat view both reuse this single bf16 copy.
    x_bf = x.astype(jnp.bfloat16)
    x_taps, (T2, H2, W2) = _extract_taps(x_bf, sub)
    S2 = T2 * H2 * W2

    if (Tg, Hg, Wg) == (T2, H2, W2):
        # Identity phi-upsample: fuse the phi 1x1x1 conv into the attention kernel
        # (no (B, I, S2) HBM round-trip, one fewer kernel launch).
        g_cf = g.reshape(B, Cg, S2).astype(jnp.bfloat16)
        att = attention_map_fused(x_taps, g_cf, params["theta_w"], params["phi_w"],
                                  params["phi_b"], params["psi_w"], params["psi_b"])
    else:
        g_cf = g.reshape(B, Cg, Tg * Hg * Wg).astype(jnp.bfloat16)
        phi_g = phi_conv(g_cf, params["phi_w"], params["phi_b"])
        phi_g = phi_g.reshape(B, I, Tg, Hg, Wg)
        phi_up = jax.image.resize(phi_g, (B, I, T2, H2, W2), method="trilinear")
        att = attention_map(x_taps, phi_up.reshape(B, I, S2),
                            params["theta_w"], params["psi_w"], params["psi_b"])
    att = att.reshape(B, 1, T2, H2, W2)

    # Upsample attention to the full input size (trilinear, align_corners=False).
    # TODO(synk): fuse this fixed-weight factor-2 expansion into the gate kernel
    # (3D tiles with a 1-voxel halo) to remove the full-resolution HBM round-trip.
    sigm_psi_f = jax.image.resize(att, (B, 1, T, H, W), method="trilinear")

    # W(att * x) with eval-mode BN folded in (fused Pallas kernel, no transposes).
    x_cf = x_bf.reshape(B, C, T * H * W)
    att_cf = sigm_psi_f.reshape(B, 1, T * H * W).astype(jnp.bfloat16)
    out = gated_w_conv(x_cf, att_cf, params["W_w"], params["W_b"])
    W_y = out.reshape(B, C, T, H, W)
    return W_y, sigm_psi_f


# --------------------------- pure-JAX f32 reference -------------------------- #

def _reference_forward(x, g, raw, sub, eps=1e-5):
    B, C, T, H, W = x.shape
    I = raw["theta_w"].shape[0]
    theta_x = lax.conv_general_dilated(
        x, raw["theta_w"], window_strides=sub, padding="VALID",
        dimension_numbers=("NCDHW", "OIDHW", "NCDHW"))
    _, _, T2, H2, W2 = theta_x.shape
    phi_g = (jnp.einsum("oc,bcdhw->bodhw", raw["phi_w"], g)
             + raw["phi_b"].reshape(1, I, 1, 1, 1))
    if phi_g.shape[2:] != (T2, H2, W2):
        phi_g = jax.image.resize(phi_g, (B, I, T2, H2, W2), method="trilinear")
    f = jnp.maximum(theta_x + phi_g, 0.0)
    psi = (jnp.einsum("oc,bcdhw->bodhw", raw["psi_w"], f)
           + raw["psi_b"].reshape(1, 1, 1, 1, 1))
    sig = jax.nn.sigmoid(psi)
    sig_up = jax.image.resize(sig, (B, 1, T, H, W), method="trilinear")
    y = sig_up * x
    wy = (jnp.einsum("oc,bcdhw->bodhw", raw["W_w"], y)
          + raw["W_b"].reshape(1, C, 1, 1, 1))
    inv_std = raw["bn_gamma"] / jnp.sqrt(raw["bn_var"] + eps)
    wy = (wy * inv_std.reshape(1, C, 1, 1, 1)
          + (raw["bn_beta"] - raw["bn_mean"] * inv_std).reshape(1, C, 1, 1, 1))
    return wy, sig_up


# ----------------------------------- main ----------------------------------- #

if __name__ == "__main__":
    key = jax.random.PRNGKey(0)
    k_param, k_x, k_ga, k_gb = jax.random.split(key, 4)

    B, C, Cg = 2, 4, 8
    T = H = W = 8          # input spatial
    sub = (2, 2, 2)

    raw = init_raw_params(k_param, in_channels=C, gating_channels=Cg,
                          sub_sample_factor=sub)
    params = prepare_kernel_params(raw)

    x = jax.random.normal(k_x, (B, C, T, H, W), jnp.float32)

    # Config A: gating signal already at theta's resolution -> fused-phi kernel path.
    g_a = jax.random.normal(k_ga, (B, Cg, 4, 4, 4), jnp.float32)
    W_y_a, att_a = grid_attention_forward(x, g_a, params, sub=sub)
    jax.block_until_ready((W_y_a, att_a))
    assert W_y_a.shape == (B, C, T, H, W)
    assert att_a.shape == (B, 1, T, H, W)
    ref_wy_a, ref_att_a = _reference_forward(x, g_a, raw, sub)
    err_wy_a = float(jnp.max(jnp.abs(W_y_a - ref_wy_a)))
    err_att_a = float(jnp.max(jnp.abs(att_a - ref_att_a)))
    assert err_wy_a < 5e-2 and err_att_a < 5e-2, (err_wy_a, err_att_a)

    # Config B: coarser gating grid -> separate phi kernel + trilinear resize path.
    g_b = jax.random.normal(k_gb, (B, Cg, 2, 2, 2), jnp.float32)
    W_y_b, att_b = grid_attention_forward(x, g_b, params, sub=sub)
    jax.block_until_ready((W_y_b, att_b))
    assert W_y_b.shape == (B, C, T, H, W)
    assert att_b.shape == (B, 1, T, H, W)
    ref_wy_b, ref_att_b = _reference_forward(x, g_b, raw, sub)
    err_wy_b = float(jnp.max(jnp.abs(W_y_b - ref_wy_b)))
    err_att_b = float(jnp.max(jnp.abs(att_b - ref_att_b)))
    assert err_wy_b < 5e-2 and err_att_b < 5e-2, (err_wy_b, err_att_b)

    print("KERNEL_OK")
</pallas_src>

<mosaic_0001>
module attributes {stable_mosaic.version = 11 : i64} {
  func.func @_attention_fused_kernel(%arg0: i32, %arg1: i32, %arg2: memref<1x32x64xbf16, #tpu.memory_space<vmem>>, %arg3: memref<1x8x64xbf16, #tpu.memory_space<vmem>>, %arg4: memref<2x32xbf16, #tpu.memory_space<vmem>>, %arg5: memref<2x8xbf16, #tpu.memory_space<vmem>>, %arg6: memref<2x1xf32, #tpu.memory_space<vmem>>, %arg7: memref<2x1xf32, #tpu.memory_space<vmem>>, %arg8: memref<1xf32, #tpu.memory_space<smem>>, %arg9: memref<1x1x64xf32, #tpu.memory_space<vmem>>) attributes {dimension_semantics = [#tpu.dimension_semantics<parallel>, #tpu.dimension_semantics<parallel>], iteration_bounds = array<i64: 2, 1>, scalar_prefetch = 0 : i64, scratch_operands = 0 : i64, tpu.core_type = #tpu.core_type<tc>, window_params = [{transform_indices = @transform_0, window_bounds = array<i64: 1, 32, 64>}, {transform_indices = @transform_1, window_bounds = array<i64: 1, 8, 64>}, {pipeline_mode = #tpu.pipeline_mode<synchronous>, transform_indices = @transform_2, window_bounds = array<i64: 2, 32>}, {pipeline_mode = #tpu.pipeline_mode<synchronous>, transform_indices = @transform_3, window_bounds = array<i64: 2, 8>}, {pipeline_mode = #tpu.pipeline_mode<synchronous>, transform_indices = @transform_4, window_bounds = array<i64: 2, 1>}, {pipeline_mode = #tpu.pipeline_mode<synchronous>, transform_indices = @transform_5, window_bounds = array<i64: 2, 1>}, {transform_indices = @transform_6, window_bounds = array<i64: 1>}, {transform_indices = @transform_7, window_bounds = array<i64: 1, 1, 64>}]} {
    %c0 = arith.constant 0 : index
    %c0_0 = arith.constant 0 : index
    %0 = vector.load %arg4[%c0, %c0_0] : memref<2x32xbf16, #tpu.memory_space<vmem>>, vector<2x32xbf16>
    %c0_1 = arith.constant 0 : index
    %c0_2 = arith.constant 0 : index
    %c0_3 = arith.constant 0 : index
    %1 = vector.load %arg2[%c0_1, %c0_2, %c0_3] : memref<1x32x64xbf16, #tpu.memory_space<vmem>>, vector<1x32x64xbf16>
    %2 = vector.shape_cast %1 : vector<1x32x64xbf16> to vector<32x64xbf16>
    %cst = arith.constant dense<0.000000e+00> : vector<2x64xf32>
    %3 = tpu.matmul %0, %2, %cst {dimension_numbers = #tpu.dot_dimension_numbers<[1], [0], [0], [1], [0, 0, 1, 1], [], []>} : vector<2x32xbf16>, vector<32x64xbf16>, vector<2x64xf32> -> vector<2x64xf32>
    %c0_4 = arith.constant 0 : index
    %c0_5 = arith.constant 0 : index
    %4 = vector.load %arg5[%c0_4, %c0_5] : memref<2x8xbf16, #tpu.memory_space<vmem>>, vector<2x8xbf16>
    %c0_6 = arith.constant 0 : index
    %c0_7 = arith.constant 0 : index
    %c0_8 = arith.constant 0 : index
    %5 = vector.load %arg3[%c0_6, %c0_7, %c0_8] : memref<1x8x64xbf16, #tpu.memory_space<vmem>>, vector<1x8x64xbf16>
    %6 = vector.shape_cast %5 : vector<1x8x64xbf16> to vector<8x64xbf16>
    %cst_9 = arith.constant dense<0.000000e+00> : vector<2x64xf32>
    %7 = tpu.matmul %4, %6, %cst_9 {dimension_numbers = #tpu.dot_dimension_numbers<[1], [0], [0], [1], [0, 0, 1, 1], [], []>} : vector<2x8xbf16>, vector<8x64xbf16>, vector<2x64xf32> -> vector<2x64xf32>
    %c0_10 = arith.constant 0 : index
    %c0_11 = arith.constant 0 : index
    %8 = vector.load %arg6[%c0_10, %c0_11] : memref<2x1xf32, #tpu.memory_space<vmem>>, vector<2x1xf32>
    %9 = vector.broadcast %8 : vector<2x1xf32> to vector<2x64xf32>
    %10 = arith.addf %7, %9 : vector<2x64xf32>
    %11 = arith.addf %3, %10 : vector<2x64xf32>
    %cst_12 = arith.constant 0.000000e+00 : f32
    %12 = vector.broadcast %cst_12 : f32 to vector<2x64xf32>
    %13 = arith.maximumf %11, %12 : vector<2x64xf32>
    %c0_13 = arith.constant 0 : index
    %c0_14 = arith.constant 0 : index
    %14 = vector.load %arg7[%c0_13, %c0_14] : memref<2x1xf32, #tpu.memory_space<vmem>>, vector<2x1xf32>
    %15 = vector.broadcast %14 : vector<2x1xf32> to vector<2x64xf32>
    %16 = arith.mulf %13, %15 : vector<2x64xf32>
    %cst_15 = arith.constant dense<0.000000e+00> : vector<64xf32>
    %17 = vector.multi_reduction <add>, %16, %cst_15 [0] : vector<2x64xf32> to vector<64xf32>
    %18 = vector.shape_cast %17 : vector<64xf32> to vector<1x64xf32>
    %c0_16 = arith.constant 0 : index
    %19 = memref.load %arg8[%c0_16] : memref<1xf32, #tpu.memory_space<smem>>
    %20 = vector.broadcast %19 : f32 to vector<1x64xf32>
    %21 = arith.addf %18, %20 : vector<1x64xf32>
    %22 = arith.negf %21 : vector<1x64xf32>
    %23 = math.exp %22 : vector<1x64xf32>
    %cst_17 = arith.constant 1.000000e+00 : f32
    %24 = vector.broadcast %cst_17 : f32 to vector<1x64xf32>
    %25 = arith.addf %24, %23 : vector<1x64xf32>
    %26 = arith.divf %24, %25 : vector<1x64xf32>
    %c0_18 = arith.constant 0 : index
    %c0_19 = arith.constant 0 : index
    %c0_20 = arith.constant 0 : index
    %27 = vector.load %arg9[%c0_18, %c0_19, %c0_20] : memref<1x1x64xf32, #tpu.memory_space<vmem>>, vector<1x1x64xf32>
    %28 = vector.shape_cast %27 : vector<1x1x64xf32> to vector<1x64xf32>
    %29 = vector.shape_cast %26 : vector<1x64xf32> to vector<1x1x64xf32>
    tpu.vector_store %arg9[%c0_18, %c0_19, %c0_20], %29 {strides = array<i32>} : memref<1x1x64xf32, #tpu.memory_space<vmem>>, vector<1x1x64xf32>,
    return
  }
  func.func @transform_0(%arg0: i32, %arg1: i32) -> (i32, i32, i32) {
    %c0_i32 = arith.constant 0 : i32
    %c0_i32_0 = arith.constant 0 : i32
    return %arg0, %c0_i32, %arg1 : i32, i32, i32
  }
  func.func @transform_1(%arg0: i32, %arg1: i32) -> (i32, i32, i32) {
    %c0_i32 = arith.constant 0 : i32
    %c0_i32_0 = arith.constant 0 : i32
    return %arg0, %c0_i32, %arg1 : i32, i32, i32
  }
  func.func @transform_2(%arg0: i32, %arg1: i32) -> (i32, i32) {
    %c0_i32 = arith.constant 0 : i32
    %c0_i32_0 = arith.constant 0 : i32
    %c0_i32_1 = arith.constant 0 : i32
    return %c0_i32, %c0_i32_0 : i32, i32
  }
  func.func @transform_3(%arg0: i32, %arg1: i32) -> (i32, i32) {
    %c0_i32 = arith.constant 0 : i32
    %c0_i32_0 = arith.constant 0 : i32
    %c0_i32_1 = arith.constant 0 : i32
    return %c0_i32, %c0_i32_0 : i32, i32
  }
  func.func @transform_4(%arg0: i32, %arg1: i32) -> (i32, i32) {
    %c0_i32 = arith.constant 0 : i32
    %c0_i32_0 = arith.constant 0 : i32
    %c0_i32_1 = arith.constant 0 : i32
    return %c0_i32, %c0_i32_0 : i32, i32
  }
  func.func @transform_5(%arg0: i32, %arg1: i32) -> (i32, i32) {
    %c0_i32 = arith.constant 0 : i32
    %c0_i32_0 = arith.constant 0 : i32
    %c0_i32_1 = arith.constant 0 : i32
    return %c0_i32, %c0_i32_0 : i32, i32
  }
  func.func @transform_6(%arg0: i32, %arg1: i32) -> i32 {
    %c0_i32 = arith.constant 0 : i32
    %c0_i32_0 = arith.constant 0 : i32
    return %c0_i32 : i32
  }
  func.func @transform_7(%arg0: i32, %arg1: i32) -> (i32, i32, i32) {
    %c0_i32 = arith.constant 0 : i32
    %c0_i32_0 = arith.constant 0 : i32
    return %arg0, %c0_i32, %arg1 : i32, i32, i32
  }
}

module attributes {stable_mosaic.version = 11 : i64} {
  func.func @_gate_w_kernel(%arg0: i32, %arg1: i32, %arg2: memref<1x4x256xbf16, #tpu.memory_space<vmem>>, %arg3: memref<1x1x256xbf16, #tpu.memory_space<vmem>>, %arg4: memref<4x4xbf16, #tpu.memory_space<vmem>>, %arg5: memref<4x1xf32, #tpu.memory_space<vmem>>, %arg6: memref<1x4x256xf32, #tpu.memory_space<vmem>>) attributes {dimension_semantics = [#tpu.dimension_semantics<parallel>, #tpu.dimension_semantics<parallel>], iteration_bounds = array<i64: 2, 2>, scalar_prefetch = 0 : i64, scratch_operands = 0 : i64, tpu.core_type = #tpu.core_type<tc>, window_params = [{transform_indices = @transform_0, window_bounds = array<i64: 1, 4, 256>}, {transform_indices = @transform_1, window_bounds = array<i64: 1, 1, 256>}, {pipeline_mode = #tpu.pipeline_mode<synchronous>, transform_indices = @transform_2, window_bounds = array<i64: 4, 4>}, {pipeline_mode = #tpu.pipeline_mode<synchronous>, transform_indices = @transform_3, window_bounds = array<i64: 4, 1>}, {transform_indices = @transform_4, window_bounds = array<i64: 1, 4, 256>}]} {
    %c0 = arith.constant 0 : index
    %c0_0 = arith.constant 0 : index
    %c0_1 = arith.constant 0 : index
    %0 = vector.load %arg2[%c0, %c0_0, %c0_1] : memref<1x4x256xbf16, #tpu.memory_space<vmem>>, vector<1x4x256xbf16>
    %1 = vector.shape_cast %0 : vector<1x4x256xbf16> to vector<4x256xbf16>
    %c0_2 = arith.constant 0 : index
    %c0_3 = arith.constant 0 : index
    %c0_4 = arith.constant 0 : index
    %2 = vector.load %arg3[%c0_2, %c0_3, %c0_4] : memref<1x1x256xbf16, #tpu.memory_space<vmem>>, vector<1x1x256xbf16>
    %3 = vector.shape_cast %2 : vector<1x1x256xbf16> to vector<1x256xbf16>
    %4 = vector.broadcast %3 : vector<1x256xbf16> to vector<4x256xbf16>
    %5 = arith.mulf %1, %4 : vector<4x256xbf16>
    %c0_5 = arith.constant 0 : index
    %c0_6 = arith.constant 0 : index
    %6 = vector.load %arg4[%c0_5, %c0_6] : memref<4x4xbf16, #tpu.memory_space<vmem>>, vector<4x4xbf16>
    %cst = arith.constant dense<0.000000e+00> : vector<4x256xf32>
    %7 = tpu.matmul %6, %5, %cst {dimension_numbers = #tpu.dot_dimension_numbers<[1], [0], [0], [1], [0, 0, 1, 1], [], []>} : vector<4x4xbf16>, vector<4x256xbf16>, vector<4x256xf32> -> vector<4x256xf32>
    %c0_7 = arith.constant 0 : index
    %c0_8 = arith.constant 0 : index
    %8 = vector.load %arg5[%c0_7, %c0_8] : memref<4x1xf32, #tpu.memory_space<vmem>>, vector<4x1xf32>
    %9 = vector.broadcast %8 : vector<4x1xf32> to vector<4x256xf32>
    %10 = arith.addf %7, %9 : vector<4x256xf32>
    %c0_9 = arith.constant 0 : index
    %c0_10 = arith.constant 0 : index
    %c0_11 = arith.constant 0 : index
    %11 = vector.load %arg6[%c0_9, %c0_10, %c0_11] : memref<1x4x256xf32, #tpu.memory_space<vmem>>, vector<1x4x256xf32>
    %12 = vector.shape_cast %11 : vector<1x4x256xf32> to vector<4x256xf32>
    %13 = vector.shape_cast %10 : vector<4x256xf32> to vector<1x4x256xf32>
    tpu.vector_store %arg6[%c0_9, %c0_10, %c0_11], %13 {strides = array<i32>} : memref<1x4x256xf32, #tpu.memory_space<vmem>>, vector<1x4x256xf32>,
    return
  }
  func.func @transform_0(%arg0: i32, %arg1: i32) -> (i32, i32, i32) {
    %c0_i32 = arith.constant 0 : i32
    %c0_i32_0 = arith.constant 0 : i32
    return %arg0, %c0_i32, %arg1 : i32, i32, i32
  }
  func.func @transform_1(%arg0: i32, %arg1: i32) -> (i32, i32, i32) {
    %c0_i32 = arith.constant 0 : i32
    %c0_i32_0 = arith.constant 0 : i32
    return %arg0, %c0_i32, %arg1 : i32, i32, i32
  }
  func.func @transform_2(%arg0: i32, %arg1: i32) -> (i32, i32) {
    %c0_i32 = arith.constant 0 : i32
    %c0_i32_0 = arith.constant 0 : i32
    %c0_i32_1 = arith.constant 0 : i32
    return %c0_i32, %c0_i32_0 : i32, i32
  }
  func.func @transform_3(%arg0: i32, %arg1: i32) -> (i32, i32) {
    %c0_i32 = arith.constant 0 : i32
    %c0_i32_0 = arith.constant 0 : i32
    %c0_i32_1 = arith.constant 0 : i32
    return %c0_i32, %c0_i32_0 : i32, i32
  }
  func.func @transform_4(%arg0: i32, %arg1: i32) -> (i32, i32, i32) {
    %c0_i32 = arith.constant 0 : i32
    %c0_i32_0 = arith.constant 0 : i32
    return %arg0, %c0_i32, %arg1 : i32, i32, i32
  }
}

</mosaic_0001>

<bundles_post_ra>
// kernel: grid_attention_forward.2
= control target key start
LH: loop header
LB: loop body
LE: loop exit
PB: predicated region body
PF: predicated region fallthrough
CT: control target
= control target key end

     0   :  { %s707_s26 = smov 0   ;;  %s709_s27 = smov 0   ;;  %s760_s0 = inlined_call_operand.vmem [shape: bf16[2,32,64], index: 0, kind: input, shape index: {}]   ;;  %s761_s1 = inlined_call_operand.vmem [shape: bf16[2,8,64], index: 1, kind: input, shape index: {}]   ;;  %s762_s2 = inlined_call_operand.vmem [shape: bf16[2,32], index: 2, kind: input, shape index: {}]   ;;  %s763_s3 = inlined_call_operand.vmem [shape: bf16[2,8], index: 3, kind: input, shape index: {}]   ;;  %s764_s4 = inlined_call_operand.vmem [shape: f32[2,1], index: 4, kind: input, shape index: {}]   ;;  %s765_s5 = inlined_call_operand.vmem [shape: f32[2,1], index: 5, kind: input, shape index: {}]   ;;  %s766_s6 = inlined_call_operand.<no memory space> [shape: f32[1], index: 6, kind: input, shape index: {}]   ;;  %s767_s7 = inlined_call_operand.vmem [shape: f32[2,1,64], index: 7, kind: output, shape index: {}]  }
   0x1   :  { %12 = sst [smem:[#allocation2]] %s766_s6  ;;  %s711_s28 = smov 0  }
   0x2 LB: > { %s30_s6 = sadd.s32 1, %s655_s27  ;;  %p570_p0 = scmp.ge.s32.totalorder %s659_s28, 1  ;;  %s659_s28 = sphi %s711_s28, %s18_s28   ;;  %s655_s27 = sphi %s709_s27, %s769_s27   ;;  %s651_s26 = sphi %s707_s26, %s768_s26  }
   0x3   : > { %p32_p1 = scmp.ge.s32.totalorder %s30_s6, 2  ;;  %p271_p2 = scmp.lt.s32.totalorder %s659_s28, 3 }
   0x5   : > { %s771_s6 = smov (%p32_p1, %s30_s6), 0  ;;  %p272_p3 = pnand %p570_p0, %p271_p2 }
   0x6   : > { %p314_p4 = scmp.lt.s32.totalorder (!%p272_p3), %s651_s26, 1  ;;  %v661_v0 = vmov (!%p272_p3), 0.0   ;;  %vm662_vm0 = vmmov (!%p272_p3), 0   ;;  %v343_v1 = vld [vmem:[%s764_s4] sm:$0x3] (!%p272_p3)  ;;  %v663_v2 = vmov (!%p272_p3), 0  }
   0x7   : > { %275 = sbr.rel (%p272_p3) target bundleno = 286 (0x11e), region = 48  ;;  %587 = vmatprep.subr.bf16.mxu1 (!%p272_p3), %v661_v0  ;;  %593 = vmatprep.subr.bf16.mxu0 (!%p272_p3), %v661_v0  ;;  %vm353_vm1 = vcmask (!%p272_p3), 1043456   ;;  %v454_v3 = vld [vmem:[%s765_s5] sm:$0x3] (!%p272_p3)  ;;  %vm349_vm2 = vcmask (!%p272_p3), 64512   ;;  %vm409_vm3 = vcmask (!%p272_p3), 261120  }
   0x8   : > { %589 = vmatprep.mubr.msk.bf16.mxu1 (!%p272_p3), %vm662_vm0, %v661_v0  ;;  %597 = vmatprep.mubr.msk.bf16.mxu0 (!%p272_p3), %vm662_vm0, %v661_v0  ;;  %v341_v5 = vld [vmem:[%s763_s3] sm:$0x1] (!%p272_p3)  ;;  %vm461_vm4 = vcmask (!%p272_p3), 517120   ;;  %s469_s22 = sld [smem:[#allocation2]] (!%p272_p3)  ;;  %vm478_vm5 = vcmask (!%p272_p3), 516096  }
   0x9   : > { %630 = vset.pattern.permute.xlu0 (!%p272_p3), %v663_v2  ;;  %v336_v9 = vld [vmem:[%s762_s2] sm:$0x1] (!%p272_p3) }
   0xa   : > { %346 = vperm.xlu0 (!%p272_p3), %630, %v343_v1  }
   0xe   : > { %s773_s26 = smov (!%p314_p4, %s651_s26), 1  ;;  %457 = vperm.xlu0 %630, %v454_v3   ;;  %v470_v30 = vstv %s469_s22 }
   0xf   : > { %s573_s8 = sshll.u32 %s773_s26, 2  ;;  %s581_s12 = sshll.u32 %s773_s26, 4 }
  0x10   : > { %s328_s11 = scalar_lea.vmem %s761_s1, %s573_s8  ;;  %s321_s17 = scalar_lea.vmem %s760_s0, %s581_s12 }
  0x11   : > { %v342_v4 = vld [vmem:[%s328_s11] sm:$0xf]  ;;  %v632_v8 = vld [vmem:[%s321_s17 + $0x8] sm:$0xff]   ;;  %s334_s25 = scalar_lea.vmem %s767_s7, %s773_s26 }
  0x12   : > { %v355_v6 = vsel %vm353_vm1, %v342_v4, 0  ;;  %v631_v7 = vld [vmem:[%s321_s17] sm:$0xff]  }
  0x13   : > { %588 = vmatpush3.bf16.msra.mxu1 %v355_v6  ;;  %594 = vmatpush3.bf16.msra.mxu0 %v631_v7 }
  0x14   : > { %595 = vmatprep.subr.bf16.mxu0 %v661_v0 }
  0x16   : > { %590 = vmatmul.mubr.msk.bf16.vlgmr.msra.gmra.mrb[0].mxu1 %vm349_vm2, %v341_v5 }
  0x17   : > { %596 = vmatpush3.bf16.msra.mxu0 %v632_v8 }
  0x1a   : > { %598 = vmatmul.mubr.msk.bf16.vlgmr.msra.gmra.mrb[0].mxu0 %vm409_vm3, %v336_v9 }
  0x89   : > { %v347_v11 = vpop.permute.xlu0 %346 }
  0x8d   : > { %v458_v22 = vpop.permute.xlu0 %457 }
  0xe9   : > { %v391_v10 = vpop.f32.mrb[0].mxu1 }
  0xea   : > { %v591_v12 = vpop.f32.mrb[1].mxu1  ;;  %v392_v13 = vadd.f32 %v391_v10, %v347_v11 }
  0xeb   : > { %v394_v14 = vpop.f32.mrb[2].mxu1 }
  0xec   : > { %v592_v15 = vpop.f32.mrb[3].mxu1 }
  0xed   : > { %v447_v16 = vpop.f32.mrb[0].mxu0 }
  0xee   : > { %v448_v17 = vadd.f32 %v447_v16, %v392_v13  ;;  %v599_v18 = vpop.f32.mrb[1].mxu0 }
  0xef   : > { %v450_v19 = vpop.f32.mrb[2].mxu0 }
  0xf0   : > { %v453_v20 = vmax.f32 %v448_v17, 0.0  ;;  %v600_v21 = vpop.f32.mrb[3].mxu0 }
  0xf2   : > { %v460_v23 = vmul.f32 %v458_v22, %v453_v20 }
  0xf4   : > { %v462_v24 = vsel %vm461_vm4, %v460_v23, 0.0 }
  0xf5   : > { %v463_v25 = vrot.slane %v462_v24, 4 }
  0xf7   : > { %v464_v26 = vadd.f32 %v463_v25, %v462_v24 }
  0xf9   : > { %v465_v27 = vrot.slane %v464_v26, 2 }
  0xfb   : > { %v466_v28 = vadd.f32 %v465_v27, %v464_v26 }
  0xfd   : > { %v467_v29 = vrot.slane %v466_v28, 1 }
  0xff   : > { %v468_v31 = vadd.f32 %v467_v29, %v466_v28 }
 0x101   : > { %v471_v32 = vadd.f32 %v470_v30, %v468_v31 }
 0x103   : > { %v578_v33 = vmul.f32 -1.442695, %v471_v32 }
 0x105   : > { %633 = vpow2.f32 %v578_v33 }
 0x10f   : > { %v634_v34 = vpop.eup %633 }
 0x110   : > { %v475_v35 = vadd.f32 1.0, %v634_v34 }
 0x112   : > { %635 = vrcp.f32 %v475_v35 }
 0x11c   : > { %v636_v36 = vpop.eup %635 }
 0x11d   : > { %479 = vst.msk [vmem:[%s334_s25] sm:$0x1] %vm478_vm5, %v636_v36 }
 0x11e PF: > { %s18_s28 = sadd.s32 1, %s659_s28   ;;  %s768_s26 = smov %s655_s27 }
 0x11f   : > { %p15_p5 = scmp.ge.s32.totalorder %s18_s28, 4   ;;  %s769_s27 = smov %s771_s6 }
 0x121   :  { %17 = sbr.rel (!%p15_p5) target bundleno = 2 (0x2), region = 81 }

// kernel: grid_attention_forward.3
= control target key start
LH: loop header
LB: loop body
LE: loop exit
PB: predicated region body
PF: predicated region fallthrough
CT: control target
= control target key end

     0   :  { %s630_s15 = smov 0   ;;  %s632_s16 = smov 0   ;;  %s695_s0 = inlined_call_operand.vmem [shape: bf16[2,4,512], index: 0, kind: input, shape index: {}]   ;;  %s696_s1 = inlined_call_operand.vmem [shape: bf16[2,1,512], index: 1, kind: input, shape index: {}]   ;;  %s697_s2 = inlined_call_operand.vmem [shape: bf16[4,4], index: 2, kind: input, shape index: {}]   ;;  %s698_s3 = inlined_call_operand.vmem [shape: f32[4,1], index: 3, kind: input, shape index: {}]   ;;  %s699_s4 = inlined_call_operand.vmem [shape: f32[2,4,512], index: 4, kind: output, shape index: {}]  }
   0x1   :  { %s634_s17 = smov 0   ;;  %s636_s18 = smov 0  }
   0x2   :  { %s638_s19 = smov 0  }
   0x3 LB: > { %s23_s20 = sadd.s32 1, %s592_s17  ;;  %s26_s21 = sadd.s32 1, %s596_s18  ;;  %s600_s19 = sphi %s638_s19, %s14_s19   ;;  %s596_s18 = sphi %s636_s18, %s703_s18   ;;  %s592_s17 = sphi %s634_s17, %s702_s17   ;;  %s588_s16 = sphi %s632_s16, %s701_s16   ;;  %s584_s15 = sphi %s630_s15, %s700_s15  }
   0x4   : > { %p24_p0 = scmp.ge.s32.totalorder %s23_s20, 2  ;;  %p504_p1 = scmp.ge.s32.totalorder %s600_s19, 1 }
   0x5   : > { %p199_p2 = scmp.lt.s32.totalorder %s600_s19, 5 }
   0x6   : > { %s705_s20 = smov (%p24_p0, %s23_s20), 0  ;;  %s707_s21 = smov (!%p24_p0, %s26_s21), %s596_s18 }
   0x7   : > { %p200_p3 = pnand %p504_p1, %p199_p2  ;;  %p28_p4 = scmp.ge.s32.totalorder %s707_s21, 2 }
   0x8   : > { %s505_s22 = sshll.u32 (!%p200_p3), %s584_s15, 1  ;;  %p242_p5 = scmp.lt.s32.totalorder (!%p200_p3), %s588_s16, 1  ;;  %v285_v0 = vlaneseq (!%p200_p3)  ;;  %v602_v1 = vmov (!%p200_p3), 1966171168   ;;  %v603_v4 = vmov (!%p200_p3), 0   ;;  %vm342_vm0 = vcmask (!%p200_p3), 1041408  }
   0x9   : > { %s709_s21 = smov (%p28_p4, %s707_s21), 0  ;;  %203 = sbr.rel (%p200_p3) target bundleno = 261 (0x105), region = 36 }
   0xa   : > { %p244_p6 = scmp.lt.s32.totalorder (!%p200_p3), %s505_s22, 3  ;;  %v283_v2 = vunpack.c.l.s4 (!%p200_p3), %v602_v1  ;;  %v286_v3 = vshrl.u32 (!%p200_p3), %v285_v0, 7  ;;  %381 = vmatprep.mubr.bf16.mxu0 (!%p200_p3), %v603_v4  ;;  %561 = vset.pattern.permute.xlu0 (!%p200_p3), %v603_v4  ;;  %v323_v5 = vld [vmem:[%s698_s3] sm:$0xf] (!%p200_p3)  ;;  %v604_v8 = vmov (!%p200_p3), 1983009808  }
   0xb   : > { %326 = vperm.xlu0 (!%p200_p3), %561, %v323_v5   ;;  %v314_v9 = vunpack.c.l.s4 (!%p200_p3), %v604_v8  ;;  %v322_v28 = vld [vmem:[%s697_s2] sm:$0x3] (!%p200_p3)  ;;  %vm338_vm1 = vcmask (!%p200_p3), 31744  }
   0xc   : > { %v284_v6 = vunpack.c.0.s8 (!%p200_p3), %v283_v2  ;;  %v301_v13 = vsub.s32 (!%p200_p3), 0, %v286_v3 }
   0xd   : > { %v315_v16 = vunpack.c.0.s8 (!%p200_p3), %v314_v9 }
   0xe   : > { %v287_v7 = vsub.s32 (!%p200_p3), %v284_v6, %v286_v3 }
   0xf   : > { %v318_v20 = vsub.s32 (!%p200_p3), %v315_v16, %v286_v3 }
  0x10   : > { %s711_s16 = smov (!%p242_p5, %s588_s16), 1  ;;  %s713_s22 = smov (!%p244_p6, %s505_s22), 3 }
  0x11   : > { %s506_s25 = sshll.u32 %s711_s16, 2 }
  0x12   : > { %s663_s26 = sadd.s32 %s506_s25, %s713_s22 }
  0x13   : > { %s258_s29 = scalar_lea.vmem %s696_s1, %s663_s26  ;;  %s507_s30 = sshll.u32 %s663_s26, 1 }
  0x14   : > { %v513_v10 = vld.sshfl [vmem:[%s258_s29] sm:$0x11 pattern:$0x75316420]  ;;  %s249_s7 = scalar_lea.vmem %s695_s0, %s507_s30  ;;  %s512_s10 = sshll.u32 %s663_s26, 2 }
  0x15   : > { %v281_v11 = vcombine.high %v513_v10, %v513_v10  ;;  %v288_v12 = vrot.slane %v513_v10, %v287_v7  ;;  %v271_v22 = vld [vmem:[%s249_s7] sm:$0xf]  ;;  %s268_s13 = scalar_lea.vmem %s699_s4, %s512_s10 }
  0x17   : > { %v295_v14 = vrot.slane %v281_v11, %v287_v7  ;;  %v297_v15 = vpack.i.b16 %v288_v12, %v288_v12 }
  0x19   : > { %v302_v17 = vrot.slane %v297_v15, %v301_v13  ;;  %v304_v18 = vpack.i.b16 %v295_v14, %v295_v14 }
  0x1b   : > { %v309_v19 = vrot.slane %v304_v18, %v301_v13 }
  0x1d   : > { %v312_v21 = vcombine.low %v302_v17, %v309_v19 }
  0x1f   : > { %v319_v23 = vrot.slane %v312_v21, %v318_v20 }
  0x21   : > { %v321_v24 = vmul.bf16 %v319_v23, %v271_v22 }
  0x23   : > { %v336_v25 = vrot.slane %v321_v24, %v318_v20 }
  0x25   : > { %v337_v26 = vcombine.high %v336_v25, %v336_v25  ;;  %v344_v27 = vsel %vm342_vm0, %v336_v25, 0 }
  0x27   : > { %514 = vmatprep.subr.msk.bf16.mxu0 %vm342_vm0, %v337_v26 }
  0x28   : > { %350 = vmatpush1.bf16.msra.mxu0 %v344_v27 }
  0x2b   : > { %515 = vmatmul.mubr.msk.bf16.vlgmr.msra.gmra.mrb[0].mxu0 %vm338_vm1, %v322_v28 }
  0x8a   : > { %v327_v29 = vpop.permute.xlu0 %326 }
  0xfe   : > { %v383_v30 = vpop.f32.mrb[0].mxu0 }
  0xff   : > { %v384_v31 = vadd.f32 %v383_v30, %v327_v29  ;;  %v385_v32 = vpop.f32.mrb[1].mxu0 }
 0x100   : > { %v386_v33 = vadd.f32 %v385_v32, %v327_v29  ;;  %v387_v34 = vpop.f32.mrb[2].mxu0 }
 0x101   : > { %v388_v35 = vpop.f32.mrb[3].mxu0 }
 0x102   : > { %v392_v36 = vcombine.low %v384_v31, %v386_v33 }
 0x104   : > { %394 = vst [vmem:[%s268_s13] sm:$0xff] %v392_v36 }
 0x105 PF: > { %s14_s19 = sadd.s32 1, %s600_s19   ;;  %s700_s15 = smov %s592_s17 }
 0x106   : > { %p11_p7 = scmp.ge.s32.totalorder %s14_s19, 6   ;;  %s701_s16 = smov %s596_s18 }
 0x107   : > { %s702_s17 = smov %s705_s20  ;;  %s703_s18 = smov %s709_s21 }
 0x108   :  { %13 = sbr.rel (!%p11_p7) target bundleno = 3 (0x3), region = 69 }

</bundles_post_ra>
